<compile_context>
chip_gen: v5e
topology: v5e:2x2
jax: 0.10.0
libtpu: 0.0.40
codegen_flags: <defaults>
</compile_context>

<pallas_src>
from functools import partial

import jax
import jax.numpy as jnp
from jax.experimental import pallas as pl
from jax.experimental.pallas import tpu as pltpu

_LANE = 128
_SUBLANE = 8
_MAX_BLOCK_ROWS = 2048      # 2048 * 128 * 4B = 1 MiB per input per buffer
_NUM_PARTIALS = 2           # split the reduction across v7x's 2 TensorCores


def _rmse_kernel(x_ref, y_ref, out_ref, acc_ref, *,
                 n_elems, block_rows, k_steps):
    p = pl.program_id(0)     # parallel partial-sum index
    k = pl.program_id(1)     # reduction step within this partial

    # Zero this partial's running (8,128) sum on its first reduction step.
    @pl.when(k == 0)
    def _():
        acc_ref[...] = jnp.zeros_like(acc_ref)

    d = x_ref[...].astype(jnp.float32) - y_ref[...].astype(jnp.float32)
    d2 = d * d

    block_elems = block_rows * _LANE
    blk = p * k_steps + k                # logical block id over the flat array
    block_start = blk * block_elems      # first flat element of this block

    # Only blocks touching the padded / out-of-range tail need masking.
    needs_mask = block_start + block_elems > n_elems

    @pl.when(jnp.logical_not(needs_mask))
    def _():
        acc_ref[...] += d2.reshape(
            block_rows // _SUBLANE, _SUBLANE, _LANE).sum(axis=0)

    @pl.when(needs_mask)
    def _():
        row_ids = jax.lax.broadcasted_iota(jnp.int32, (block_rows, _LANE), 0)
        lane_ids = jax.lax.broadcasted_iota(jnp.int32, (block_rows, _LANE), 1)
        gidx = block_start + row_ids * _LANE + lane_ids
        d2m = jnp.where(gidx < n_elems, d2, 0.0)
        acc_ref[...] += d2m.reshape(
            block_rows // _SUBLANE, _SUBLANE, _LANE).sum(axis=0)

    # Finalize this partial: single cross-lane/sublane reduce to a scalar SSE.
    @pl.when(k == k_steps - 1)
    def _():
        out_ref[...] = jnp.sum(acc_ref[...], keepdims=True)


def rmse_loss(x, y):
    """sqrt(mean((x - y)**2)) — matches torch.sqrt(nn.MSELoss()(x, y))."""
    assert x.shape == y.shape
    n = x.size

    xf = jnp.ravel(x)
    yf = jnp.ravel(y)

    # Minimal alignment pad (< 1024 elems, only if needed) so the flat array
    # reshapes to a lane-dense, sublane-aligned (rows, 128) slab.  Padded
    # elements are masked out in-kernel, so their values are irrelevant.
    tile_elems = _SUBLANE * _LANE
    padded = pl.cdiv(n, tile_elems) * tile_elems
    if padded != n:
        xf = jnp.pad(xf, (0, padded - n))
        yf = jnp.pad(yf, (0, padded - n))

    rows = padded // _LANE
    x2 = xf.reshape(rows, _LANE)
    y2 = yf.reshape(rows, _LANE)

    block_rows = min(_MAX_BLOCK_ROWS, rows)          # always a multiple of 8
    total_blocks = pl.cdiv(rows, block_rows)
    num_partials = min(_NUM_PARTIALS, total_blocks)
    k_steps = pl.cdiv(total_blocks, num_partials)

    def in_map(pp, kk):
        # Logical block ids past the real range are clamped to the last real
        # block; the kernel masks their contribution to zero.
        return (jnp.minimum(pp * k_steps + kk, total_blocks - 1), 0)

    partial_sse = pl.pallas_call(
        partial(_rmse_kernel, n_elems=n, block_rows=block_rows,
                k_steps=k_steps),
        out_shape=jax.ShapeDtypeStruct((num_partials, 1), jnp.float32),
        grid=(num_partials, k_steps),
        in_specs=[
            pl.BlockSpec((block_rows, _LANE), in_map),
            pl.BlockSpec((block_rows, _LANE), in_map),
        ],
        out_specs=pl.BlockSpec((1, 1), lambda pp, kk: (pp, 0)),
        scratch_shapes=[pltpu.VMEM((_SUBLANE, _LANE), jnp.float32)],
        compiler_params=pltpu.CompilerParams(
            dimension_semantics=("parallel", "arbitrary"),
        ),
    )(x2, y2)

    # Combine per-core partial sums, take the mean over the TRUE count, sqrt.
    return jnp.sqrt(jnp.sum(partial_sse) / jnp.float32(n))


if __name__ == "__main__":
    key = jax.random.PRNGKey(0)
    kx, ky = jax.random.split(key)
    # Small NCHW-shaped example inputs (RMSELoss is shape-agnostic).
    x = jax.random.normal(kx, (2, 4, 16, 16), dtype=jnp.float32)
    y = jax.random.normal(ky, (2, 4, 16, 16), dtype=jnp.float32)

    loss = jax.block_until_ready(rmse_loss(x, y))

    # Reference check against plain JAX.
    ref = jnp.sqrt(jnp.mean((x - y) ** 2))
    assert jnp.allclose(loss, ref, rtol=1e-5, atol=1e-6), (loss, ref)

    print("KERNEL_OK")
</pallas_src>

<mosaic_0001>
module attributes {stable_mosaic.version = 11 : i64} {
  func.func @_rmse_kernel(%arg0: i32, %arg1: i32, %arg2: memref<16x128xf32, #tpu.memory_space<vmem>>, %arg3: memref<16x128xf32, #tpu.memory_space<vmem>>, %arg4: memref<1x1xf32, #tpu.memory_space<vmem>>, %arg5: memref<8x128xf32, #tpu.memory_space<vmem>>) attributes {dimension_semantics = [#tpu.dimension_semantics<parallel>, #tpu.dimension_semantics<arbitrary>], iteration_bounds = array<i64: 1, 1>, scalar_prefetch = 0 : i64, scratch_operands = 1 : i64, tpu.core_type = #tpu.core_type<tc>, window_params = [{transform_indices = @transform_0, window_bounds = array<i64: 16, 128>}, {transform_indices = @transform_1, window_bounds = array<i64: 16, 128>}, {transform_indices = @transform_2, window_bounds = array<i64: 1, 1>}]} {
    %c0_i32 = arith.constant 0 : i32
    %0 = arith.cmpi eq, %arg1, %c0_i32 : i32
    %1 = arith.extui %0 : i1 to i32
    %c0_i32_0 = arith.constant 0 : i32
    %2 = arith.cmpi ne, %1, %c0_i32_0 : i32
    scf.if %2 {
      %cst = arith.constant 0.000000e+00 : f32
      %20 = vector.broadcast %cst : f32 to vector<8x128xf32>
      %c0_10 = arith.constant 0 : index
      %c0_11 = arith.constant 0 : index
      %21 = vector.load %arg5[%c0_10, %c0_11] : memref<8x128xf32, #tpu.memory_space<vmem>>, vector<8x128xf32>
      tpu.vector_store %arg5[%c0_10, %c0_11], %20 {strides = array<i32>} : memref<8x128xf32, #tpu.memory_space<vmem>>, vector<8x128xf32>,
    } else {
    }
    %c0 = arith.constant 0 : index
    %c0_1 = arith.constant 0 : index
    %3 = vector.load %arg2[%c0, %c0_1] : memref<16x128xf32, #tpu.memory_space<vmem>>, vector<16x128xf32>
    %c0_2 = arith.constant 0 : index
    %c0_3 = arith.constant 0 : index
    %4 = vector.load %arg3[%c0_2, %c0_3] : memref<16x128xf32, #tpu.memory_space<vmem>>, vector<16x128xf32>
    %5 = arith.subf %3, %4 : vector<16x128xf32>
    %6 = arith.mulf %5, %5 : vector<16x128xf32>
    %c1_i32 = arith.constant 1 : i32
    %7 = arith.muli %arg0, %c1_i32 : i32
    %8 = arith.addi %7, %arg1 : i32
    %c2048_i32 = arith.constant 2048 : i32
    %9 = arith.muli %8, %c2048_i32 : i32
    %c2048_i32_4 = arith.constant 2048 : i32
    %10 = arith.addi %9, %c2048_i32_4 : i32
    %c2048_i32_5 = arith.constant 2048 : i32
    %11 = arith.cmpi sgt, %10, %c2048_i32_5 : i32
    %true = arith.constant true
    %12 = arith.xori %11, %true : i1
    %13 = arith.extui %12 : i1 to i32
    %c0_i32_6 = arith.constant 0 : i32
    %14 = arith.cmpi ne, %13, %c0_i32_6 : i32
    scf.if %14 {
      %c0_10 = arith.constant 0 : index
      %c0_11 = arith.constant 0 : index
      %20 = vector.load %arg5[%c0_10, %c0_11] : memref<8x128xf32, #tpu.memory_space<vmem>>, vector<8x128xf32>
      %21 = vector.shape_cast %6 : vector<16x128xf32> to vector<2x8x128xf32>
      %cst = arith.constant dense<0.000000e+00> : vector<8x128xf32>
      %22 = vector.multi_reduction <add>, %21, %cst [0] : vector<2x8x128xf32> to vector<8x128xf32>
      %23 = arith.addf %20, %22 : vector<8x128xf32>
      %c0_12 = arith.constant 0 : index
      %c0_13 = arith.constant 0 : index
      %24 = vector.load %arg5[%c0_12, %c0_13] : memref<8x128xf32, #tpu.memory_space<vmem>>, vector<8x128xf32>
      tpu.vector_store %arg5[%c0_12, %c0_13], %23 {strides = array<i32>} : memref<8x128xf32, #tpu.memory_space<vmem>>, vector<8x128xf32>,
    } else {
    }
    %15 = arith.extui %11 : i1 to i32
    %c0_i32_7 = arith.constant 0 : i32
    %16 = arith.cmpi ne, %15, %c0_i32_7 : i32
    scf.if %16 {
      %20 = tpu.iota {dimensions = array<i32: 0>} : vector<16x128xi32>
      %21 = tpu.iota {dimensions = array<i32: 1>} : vector<16x128xi32>
      %c128_i32 = arith.constant 128 : i32
      %22 = vector.broadcast %c128_i32 : i32 to vector<16x128xi32>
      %23 = arith.muli %20, %22 : vector<16x128xi32>
      %24 = vector.broadcast %9 : i32 to vector<16x128xi32>
      %25 = arith.addi %24, %23 : vector<16x128xi32>
      %26 = arith.addi %25, %21 : vector<16x128xi32>
      %c2048_i32_10 = arith.constant 2048 : i32
      %27 = vector.broadcast %c2048_i32_10 : i32 to vector<16x128xi32>
      %28 = arith.cmpi slt, %26, %27 : vector<16x128xi32>
      %cst = arith.constant 0.000000e+00 : f32
      %29 = vector.broadcast %cst : f32 to vector<16x128xf32>
      %30 = arith.select %28, %6, %29 : vector<16x128xi1>, vector<16x128xf32>
      %c0_11 = arith.constant 0 : index
      %c0_12 = arith.constant 0 : index
      %31 = vector.load %arg5[%c0_11, %c0_12] : memref<8x128xf32, #tpu.memory_space<vmem>>, vector<8x128xf32>
      %32 = vector.shape_cast %30 : vector<16x128xf32> to vector<2x8x128xf32>
      %cst_13 = arith.constant dense<0.000000e+00> : vector<8x128xf32>
      %33 = vector.multi_reduction <add>, %32, %cst_13 [0] : vector<2x8x128xf32> to vector<8x128xf32>
      %34 = arith.addf %31, %33 : vector<8x128xf32>
      %c0_14 = arith.constant 0 : index
      %c0_15 = arith.constant 0 : index
      %35 = vector.load %arg5[%c0_14, %c0_15] : memref<8x128xf32, #tpu.memory_space<vmem>>, vector<8x128xf32>
      tpu.vector_store %arg5[%c0_14, %c0_15], %34 {strides = array<i32>} : memref<8x128xf32, #tpu.memory_space<vmem>>, vector<8x128xf32>,
    } else {
    }
    %c0_i32_8 = arith.constant 0 : i32
    %17 = arith.cmpi eq, %arg1, %c0_i32_8 : i32
    %18 = arith.extui %17 : i1 to i32
    %c0_i32_9 = arith.constant 0 : i32
    %19 = arith.cmpi ne, %18, %c0_i32_9 : i32
    scf.if %19 {
      %c0_10 = arith.constant 0 : index
      %c0_11 = arith.constant 0 : index
      %20 = vector.load %arg5[%c0_10, %c0_11] : memref<8x128xf32, #tpu.memory_space<vmem>>, vector<8x128xf32>
      %21 = vector.shape_cast %20 : vector<8x128xf32> to vector<1x8x128xf32>
      %cst = arith.constant dense<0.000000e+00> : vector<1xf32>
      %22 = vector.multi_reduction <add>, %21, %cst [1, 2] : vector<1x8x128xf32> to vector<1xf32>
      %23 = vector.shape_cast %22 : vector<1xf32> to vector<1x1x1xf32>
      %24 = vector.extract %23[0, 0, 0] : f32 from vector<1x1x1xf32>
      %25 = vector.broadcast %24 : f32 to vector<1x1xf32>
      %c0_12 = arith.constant 0 : index
      %c0_13 = arith.constant 0 : index
      %26 = vector.load %arg4[%c0_12, %c0_13] : memref<1x1xf32, #tpu.memory_space<vmem>>, vector<1x1xf32>
      tpu.vector_store %arg4[%c0_12, %c0_13], %25 {strides = array<i32>} : memref<1x1xf32, #tpu.memory_space<vmem>>, vector<1x1xf32>,
    } else {
    }
    return
  }
  func.func @transform_0(%arg0: i32, %arg1: i32) -> (i32, i32) {
    %c1_i32 = arith.constant 1 : i32
    %0 = arith.muli %arg0, %c1_i32 : i32
    %1 = arith.addi %0, %arg1 : i32
    %c0_i32 = arith.constant 0 : i32
    %2 = arith.minsi %1, %c0_i32 : i32
    %c0_i32_0 = arith.constant 0 : i32
    %c0_i32_1 = arith.constant 0 : i32
    return %2, %c0_i32_0 : i32, i32
  }
  func.func @transform_1(%arg0: i32, %arg1: i32) -> (i32, i32) {
    %c1_i32 = arith.constant 1 : i32
    %0 = arith.muli %arg0, %c1_i32 : i32
    %1 = arith.addi %0, %arg1 : i32
    %c0_i32 = arith.constant 0 : i32
    %2 = arith.minsi %1, %c0_i32 : i32
    %c0_i32_0 = arith.constant 0 : i32
    %c0_i32_1 = arith.constant 0 : i32
    return %2, %c0_i32_0 : i32, i32
  }
  func.func @transform_2(%arg0: i32, %arg1: i32) -> (i32, i32) {
    %c0_i32 = arith.constant 0 : i32
    %c0_i32_0 = arith.constant 0 : i32
    return %arg0, %c0_i32 : i32, i32
  }
}

</mosaic_0001>

<bundles_post_ra>
// kernel: tpu_custom_call.1
= control target key start
LH: loop header
LB: loop body
LE: loop exit
PB: predicated region body
PF: predicated region fallthrough
CT: control target
= control target key end

     0   :  { %7 = vsyncpa [#allocation4], 0  ;;  %s264_s0 = inlined_call_operand.hbm [shape: f32[16,128], index: 0, kind: input, shape index: {}]   ;;  %s265_s1 = inlined_call_operand.hbm [shape: f32[16,128], index: 1, kind: input, shape index: {}]   ;;  %s266_s2 = inlined_call_operand.hbm [shape: f32[1,1], index: 2, kind: output, shape index: {}]  }
   0x1   :  { %8 = vsyncpa [#allocation7], 0 }
   0x2   :  { %9 = vsyncpa [#allocation5], 0  ;;  %s20_s11 = sshll.u32 %s264_s0, 4  ;;  %s235_s12 = smov [#allocation3]   ;;  %s21_s11 = int_to_ptr.hbm [resolvable:$true] %s20_s11 }
   0x3   :  { %s22_s13 = sshll.u32 %s235_s12, 4  ;;  %s39_s16 = sshll.u32 %s265_s1, 4  ;;  %s23_s13 = int_to_ptr.vmem [resolvable:$true] %s22_s13  ;;  %s40_s16 = int_to_ptr.hbm [resolvable:$true] %s39_s16 }
   0x4   :  { %s236_s17 = smov 128   ;;  %s237_s18 = smov 8  }
   0x5   :  { %28 = dma.hbm_to_vmem [thread:$0]  %s21_s11, 256, %s23_s13, [#allocation4], %s236_s17, %s236_s17, %s237_s18  }
   0x6   :  { %s238_s19 = smov [#allocation6]  }
   0x7   :  { %s41_s20 = sshll.u32 %s238_s19, 4  ;;  %s42_s20 = int_to_ptr.vmem [resolvable:$true] %s41_s20 }
   0x8   :  { %47 = dma.hbm_to_vmem [thread:$0]  %s40_s16, 256, %s42_s20, [#allocation7], %s236_s17, %s236_s17, %s237_s18  }
   0x9   :  { %229 = dma.done.wait [#allocation4], 256  }
   0xa   :  { %230 = vsyncadd [#allocation4], 4294967040 }
   0xb   :  { %231 = dma.done.wait [#allocation7], 256  }
   0xc   :  { %232 = vsyncadd [#allocation7], 4294967040  ;;  %v69_v0 = vld [vmem:[#allocation3] sm:$0xff]  ;;  %v70_v1 = vld [vmem:[#allocation3 + $0x8] sm:$0xff]  ;;  %s239_s0 = smov [#allocation8]   ;;  %s135_s23 = sshll.u32 %s266_s2, 4  ;;  %s136_s23 = int_to_ptr.hbm [resolvable:$true] %s135_s23 }
   0xd   :  { %v71_v2 = vld [vmem:[#allocation6] sm:$0xff]  ;;  %v72_v3 = vld [vmem:[#allocation6 + $0x8] sm:$0xff]  ;;  %s133_s1 = sshll.u32 %s239_s0, 4  ;;  %vm126_vm0 = vcmask 0   ;;  %s134_s1 = int_to_ptr.vmem [resolvable:$true] %s133_s1 }
   0xe   :  { %v73_v4 = vsub.f32 %v69_v0, %v71_v2  ;;  %v74_v5 = vsub.f32 %v70_v1, %v72_v3 }
  0x10   :  { %v75_v6 = vmul.f32 %v73_v4, %v73_v4  ;;  %v76_v7 = vmul.f32 %v74_v5, %v74_v5 }
  0x12   :  { %v86_v8 = vadd.f32 %v76_v7, %v75_v6 }
  0x14   :  { %116 = vadd.xlane.f32.xlu0 %v86_v8 }
  0x87   :  { %v117_v9 = vpop.xlane.xlu0 %116 }
  0x88   :  { %v118_v10 = vrot.slane %v117_v9, 4 }
  0x8a   :  { %v119_v11 = vadd.f32 %v118_v10, %v117_v9 }
  0x8c   :  { %v120_v12 = vrot.slane %v119_v11, 2 }
  0x8e   :  { %v121_v13 = vadd.f32 %v120_v12, %v119_v11 }
  0x90   :  { %v122_v14 = vrot.slane %v121_v13, 1 }
  0x92   :  { %v123_v15 = vadd.f32 %v122_v14, %v121_v13 }
  0x94   :  { %150 = vpush %v123_v15 }
  0xc5   :  { %s151_s24 = spop %150 }
  0xc6   :  { %v125_v16 = vstv %s151_s24 }
  0xc7   :  { %127 = vst.msk [vmem:[#allocation8] sm:$0x1] %vm126_vm0, %v125_v16 }
  0xc8   :  { %138 = dma.vmem_to_hbm [thread:$0]  %s134_s1, 16, %s136_s23, [#allocation5]  }
  0xc9   :  { %233 = dma.done.wait [#allocation5], 16  }
  0xca   :  { %234 = vsyncadd [#allocation5], 4294967280 }
  0xcb   :  { %143 = vsyncpa [#allocation4], 1 }
  0xcc   :  { %144 = vsyncpa [#allocation7], 1 }
  0xcd   :  { %145 = vsyncpa [#allocation5], 1 }

</bundles_post_ra>
